<compile_context>
chip_gen: v5e
topology: v5e:2x2
jax: 0.10.0
libtpu: 0.0.40
codegen_flags: <defaults>
</compile_context>

<pallas_src>
import functools

import jax
import jax.numpy as jnp
from jax.experimental import pallas as pl
from jax.experimental.pallas import tpu as pltpu


def _transition_kernel(x_ref, scale_ref, bias_ref, w_ref, out_ref, *, w2, cin):
    """One (batch, row-tile) block per grid step.

    x_ref    : (1, TH*W2, 2*Cin)  input, W-parity folded into the lane dim
    scale_ref: (1, 2*Cin)         folded BN scale  = gamma / sqrt(var + eps), tiled x2
    bias_ref : (1, 2*Cin)         folded BN bias   = beta - mean * scale,   tiled x2
    w_ref    : (Cin, Cout)        bf16 1x1 conv weight (transposed, * 0.25 pool factor)
    out_ref  : (1, TH2*W2, Cout)
    """
    ts = x_ref.shape[1]          # TH * W2
    s2 = out_ref.shape[1]        # (TH // 2) * W2
    th = ts // w2                # image rows in this tile

    # BatchNorm (eval, folded) + ReLU in f32 on the VPU.
    x = x_ref[0]                                             # (TS, 2*Cin)
    y = jnp.maximum(x * scale_ref[...] + bias_ref[...], 0.0)

    # 2x2 average pool as VPU adds (the *0.25 is folded into the conv weight).
    #   W-pool: the two W-parities are the two lane halves.
    yw = y[:, :cin] + y[:, cin:]                             # (TS, Cin)
    #   H-pool: adjacent image rows are adjacent W2-row blocks of the
    #   flattened spatial dim -> size-2 reduction over a major axis.
    yp = yw.reshape(th // 2, 2, w2, cin).sum(axis=1)         # (TH2, W2, Cin)
    pooled = yp.reshape(s2, cin)                             # (TH2*W2, Cin)

    # 1x1 conv == matmul over channels; bf16 MXU inputs, f32 accumulation.
    out_ref[0] = jnp.dot(pooled.astype(jnp.bfloat16), w_ref[...],
                         preferred_element_type=jnp.float32
                         ).astype(out_ref.dtype)


def _pick_tile_rows(H, W2, Cin, max_bytes=2 << 20):
    """Largest even row-tile TH dividing H whose f32 x-block fits max_bytes
    and whose blocks satisfy the (8,128) sublane constraint."""
    row_bytes = W2 * 2 * Cin * 4
    best = H  # whole image always legal (block == full dim)
    if H % 2 != 0:
        return best
    cand = None
    for th in range(2, H + 1, 2):
        if H % th:
            continue
        ok_shape = (th == H) or ((th * W2) % 8 == 0 and ((th // 2) * W2) % 8 == 0)
        if ok_shape and th * row_bytes <= max_bytes:
            cand = th
    return cand if cand is not None else best


@functools.partial(jax.jit, static_argnames=("tile_rows",))
def transition_block_forward(x_nchw, gamma, beta, running_mean, running_var,
                             conv_weight, *, tile_rows=None):
    """Forward pass matching TransitionBlock (eval mode, drop_out=0.0).

    x_nchw      : (N, Cin, H, W)       float32
    gamma/beta  : (Cin,)               BN affine params
    running_*   : (Cin,)               BN running stats
    conv_weight : (Cout, Cin, 1, 1)    PyTorch 1x1 conv weight (no bias)
    returns     : (N, Cout, H//2, W//2)
    """
    eps = 1e-5
    N, Cin, H, W = x_nchw.shape
    Cout = conv_weight.shape[0]
    if H % 2 or W % 2:
        raise ValueError("H and W must be even for the 2x2/stride-2 pool.")
    H2, W2 = H // 2, W // 2

    # Fold BN running stats into per-channel scale/bias; tile x2 to match the
    # W-parity-folded lane layout (lane = (w % 2) * Cin + c).
    scale = gamma / jnp.sqrt(running_var + eps)                    # (Cin,)
    bias = beta - running_mean * scale                             # (Cin,)
    scale2 = jnp.tile(scale, 2).reshape(1, 2 * Cin).astype(jnp.float32)
    bias2 = jnp.tile(bias, 2).reshape(1, 2 * Cin).astype(jnp.float32)

    # 1x1 conv weight -> (Cin, Cout) matmul weight, with the 0.25 avg-pool
    # factor folded in (conv and avg-pool are both linear). bf16 for the MXU.
    wmat = (conv_weight.reshape(Cout, Cin).T * 0.25).astype(jnp.bfloat16)

    # NCHW -> NHWC (one pass), then a FREE reshape folding the W-parity bit
    # into the channel/lane dim: (N, H, W, C) -> (N, H*W2, 2*C).
    x_nhwc = jnp.transpose(x_nchw, (0, 2, 3, 1)).astype(jnp.float32)
    xf = x_nhwc.reshape(N, H * W2, 2 * Cin)

    if tile_rows is None:
        tile_rows = _pick_tile_rows(H, W2, Cin)
    TH = int(tile_rows)
    if H % TH or TH % 2:
        raise ValueError(f"tile_rows={TH} must be even and divide H={H}.")
    if TH != H and ((TH * W2) % 8 or ((TH // 2) * W2) % 8):
        raise ValueError(f"tile_rows={TH} gives blocks violating the sublane "
                         f"constraint for W2={W2}.")
    TH2 = TH // 2
    grid = (N, H // TH)

    kernel = functools.partial(_transition_kernel, w2=W2, cin=Cin)

    out_flat = pl.pallas_call(
        kernel,
        out_shape=jax.ShapeDtypeStruct((N, H2 * W2, Cout), jnp.float32),
        grid_spec=pltpu.PrefetchScalarGridSpec(
            num_scalar_prefetch=0,
            grid=grid,
            in_specs=[
                pl.BlockSpec((1, TH * W2, 2 * Cin), lambda n, t: (n, t, 0)),
                pl.BlockSpec((1, 2 * Cin), lambda n, t: (0, 0)),
                pl.BlockSpec((1, 2 * Cin), lambda n, t: (0, 0)),
                pl.BlockSpec((Cin, Cout), lambda n, t: (0, 0)),
            ],
            out_specs=pl.BlockSpec((1, TH2 * W2, Cout), lambda n, t: (n, t, 0)),
        ),
        compiler_params=pltpu.CompilerParams(
            dimension_semantics=("parallel", "parallel"),
            vmem_limit_bytes=32 * 1024 * 1024,
        ),
    )(xf, scale2, bias2, wmat)

    # Flattened (N, H2*W2, Cout) -> NCHW to match the PyTorch module.
    out_nhwc = out_flat.reshape(N, H2, W2, Cout)
    return jnp.transpose(out_nhwc, (0, 3, 1, 2))


def _reference_forward(x_nchw, gamma, beta, running_mean, running_var,
                       conv_weight):
    """Plain-JAX reference (same semantics as the PyTorch module, NCHW, f32)."""
    eps = 1e-5
    scale = (gamma / jnp.sqrt(running_var + eps)).reshape(1, -1, 1, 1)
    bias = (beta - running_mean * gamma / jnp.sqrt(running_var + eps)).reshape(1, -1, 1, 1)
    y = jnp.maximum(x_nchw * scale + bias, 0.0)
    Cout, Cin, _, _ = conv_weight.shape
    o = jnp.einsum("nchw,kc->nkhw", y, conv_weight.reshape(Cout, Cin))
    N, K, H, W = o.shape
    return o.reshape(N, K, H // 2, 2, W // 2, 2).mean(axis=(3, 5))


if __name__ == "__main__":
    key = jax.random.PRNGKey(0)
    N, Cin, Cout, H, W = 2, 8, 4, 16, 16

    k = jax.random.split(key, 6)
    x = jax.random.normal(k[0], (N, Cin, H, W), dtype=jnp.float32)
    gamma = jax.random.normal(k[1], (Cin,), dtype=jnp.float32) * 0.1 + 1.0
    beta = jax.random.normal(k[2], (Cin,), dtype=jnp.float32) * 0.1
    running_mean = jax.random.normal(k[3], (Cin,), dtype=jnp.float32) * 0.1
    running_var = jax.random.uniform(k[4], (Cin,), dtype=jnp.float32,
                                     minval=0.5, maxval=1.5)
    conv_weight = jax.random.normal(k[5], (Cout, Cin, 1, 1),
                                    dtype=jnp.float32) * 0.1

    ref = _reference_forward(x, gamma, beta, running_mean, running_var,
                             conv_weight)

    # Multi-tile spatial grid (grid = (2, 2)) to exercise the pipeline path.
    out = transition_block_forward(x, gamma, beta, running_mean, running_var,
                                   conv_weight, tile_rows=8)
    out = jax.block_until_ready(out)
    assert out.shape == (N, Cout, H // 2, W // 2), out.shape
    # bf16 MXU inputs -> relaxed tolerance vs the f32 reference.
    assert jnp.allclose(out, ref, atol=2e-2, rtol=2e-2), (
        float(jnp.max(jnp.abs(out - ref))))

    # Auto-picked tile size (whole image per step at this tiny shape).
    out2 = transition_block_forward(x, gamma, beta, running_mean, running_var,
                                    conv_weight)
    out2 = jax.block_until_ready(out2)
    assert jnp.allclose(out2, ref, atol=2e-2, rtol=2e-2), (
        float(jnp.max(jnp.abs(out2 - ref))))

    print("KERNEL_OK")
</pallas_src>

<mosaic_0001>
module attributes {stable_mosaic.version = 11 : i64} {
  func.func @_transition_kernel(%arg0: i32, %arg1: i32, %arg2: memref<1x64x16xf32, #tpu.memory_space<vmem>>, %arg3: memref<1x16xf32, #tpu.memory_space<vmem>>, %arg4: memref<1x16xf32, #tpu.memory_space<vmem>>, %arg5: memref<8x4xbf16, #tpu.memory_space<vmem>>, %arg6: memref<1x32x4xf32, #tpu.memory_space<vmem>>) attributes {dimension_semantics = [#tpu.dimension_semantics<parallel>, #tpu.dimension_semantics<parallel>], iteration_bounds = array<i64: 2, 2>, scalar_prefetch = 0 : i64, scratch_operands = 0 : i64, tpu.core_type = #tpu.core_type<tc>, window_params = [{transform_indices = @transform_0, window_bounds = array<i64: 1, 64, 16>}, {pipeline_mode = #tpu.pipeline_mode<synchronous>, transform_indices = @transform_1, window_bounds = array<i64: 1, 16>}, {pipeline_mode = #tpu.pipeline_mode<synchronous>, transform_indices = @transform_2, window_bounds = array<i64: 1, 16>}, {pipeline_mode = #tpu.pipeline_mode<synchronous>, transform_indices = @transform_3, window_bounds = array<i64: 8, 4>}, {transform_indices = @transform_4, window_bounds = array<i64: 1, 32, 4>}]} {
    %c0 = arith.constant 0 : index
    %c0_0 = arith.constant 0 : index
    %c0_1 = arith.constant 0 : index
    %0 = vector.load %arg2[%c0, %c0_0, %c0_1] : memref<1x64x16xf32, #tpu.memory_space<vmem>>, vector<1x64x16xf32>
    %1 = vector.shape_cast %0 : vector<1x64x16xf32> to vector<64x16xf32>
    %c0_2 = arith.constant 0 : index
    %c0_3 = arith.constant 0 : index
    %2 = vector.load %arg3[%c0_2, %c0_3] : memref<1x16xf32, #tpu.memory_space<vmem>>, vector<1x16xf32>
    %3 = vector.broadcast %2 : vector<1x16xf32> to vector<64x16xf32>
    %4 = arith.mulf %1, %3 : vector<64x16xf32>
    %c0_4 = arith.constant 0 : index
    %c0_5 = arith.constant 0 : index
    %5 = vector.load %arg4[%c0_4, %c0_5] : memref<1x16xf32, #tpu.memory_space<vmem>>, vector<1x16xf32>
    %6 = vector.broadcast %5 : vector<1x16xf32> to vector<64x16xf32>
    %7 = arith.addf %4, %6 : vector<64x16xf32>
    %cst = arith.constant 0.000000e+00 : f32
    %8 = vector.broadcast %cst : f32 to vector<64x16xf32>
    %9 = arith.maximumf %7, %8 : vector<64x16xf32>
    %10 = vector.extract_strided_slice %9 {offsets = [0, 0], sizes = [64, 8], strides = [1, 1]} : vector<64x16xf32> to vector<64x8xf32>
    %11 = vector.extract_strided_slice %9 {offsets = [0, 8], sizes = [64, 8], strides = [1, 1]} : vector<64x16xf32> to vector<64x8xf32>
    %12 = arith.addf %10, %11 : vector<64x8xf32>
    %13 = vector.shape_cast %12 : vector<64x8xf32> to vector<4x2x8x8xf32>
    %cst_6 = arith.constant dense<0.000000e+00> : vector<4x8x8xf32>
    %14 = vector.multi_reduction <add>, %13, %cst_6 [1] : vector<4x2x8x8xf32> to vector<4x8x8xf32>
    %15 = vector.shape_cast %14 : vector<4x8x8xf32> to vector<32x8xf32>
    %16 = arith.truncf %15 : vector<32x8xf32> to vector<32x8xbf16>
    %c0_7 = arith.constant 0 : index
    %c0_8 = arith.constant 0 : index
    %17 = vector.load %arg5[%c0_7, %c0_8] : memref<8x4xbf16, #tpu.memory_space<vmem>>, vector<8x4xbf16>
    %cst_9 = arith.constant dense<0.000000e+00> : vector<32x4xf32>
    %18 = tpu.matmul %16, %17, %cst_9 {dimension_numbers = #tpu.dot_dimension_numbers<[1], [0], [0], [1], [0, 0, 1, 1], [], []>} : vector<32x8xbf16>, vector<8x4xbf16>, vector<32x4xf32> -> vector<32x4xf32>
    %c0_10 = arith.constant 0 : index
    %c0_11 = arith.constant 0 : index
    %c0_12 = arith.constant 0 : index
    %19 = vector.load %arg6[%c0_10, %c0_11, %c0_12] : memref<1x32x4xf32, #tpu.memory_space<vmem>>, vector<1x32x4xf32>
    %20 = vector.shape_cast %19 : vector<1x32x4xf32> to vector<32x4xf32>
    %21 = vector.shape_cast %18 : vector<32x4xf32> to vector<1x32x4xf32>
    tpu.vector_store %arg6[%c0_10, %c0_11, %c0_12], %21 {strides = array<i32>} : memref<1x32x4xf32, #tpu.memory_space<vmem>>, vector<1x32x4xf32>,
    return
  }
  func.func @transform_0(%arg0: i32, %arg1: i32) -> (i32, i32, i32) {
    %c0_i32 = arith.constant 0 : i32
    %c0_i32_0 = arith.constant 0 : i32
    return %arg0, %arg1, %c0_i32 : i32, i32, i32
  }
  func.func @transform_1(%arg0: i32, %arg1: i32) -> (i32, i32) {
    %c0_i32 = arith.constant 0 : i32
    %c0_i32_0 = arith.constant 0 : i32
    %c0_i32_1 = arith.constant 0 : i32
    return %c0_i32, %c0_i32_0 : i32, i32
  }
  func.func @transform_2(%arg0: i32, %arg1: i32) -> (i32, i32) {
    %c0_i32 = arith.constant 0 : i32
    %c0_i32_0 = arith.constant 0 : i32
    %c0_i32_1 = arith.constant 0 : i32
    return %c0_i32, %c0_i32_0 : i32, i32
  }
  func.func @transform_3(%arg0: i32, %arg1: i32) -> (i32, i32) {
    %c0_i32 = arith.constant 0 : i32
    %c0_i32_0 = arith.constant 0 : i32
    %c0_i32_1 = arith.constant 0 : i32
    return %c0_i32, %c0_i32_0 : i32, i32
  }
  func.func @transform_4(%arg0: i32, %arg1: i32) -> (i32, i32, i32) {
    %c0_i32 = arith.constant 0 : i32
    %c0_i32_0 = arith.constant 0 : i32
    return %arg0, %arg1, %c0_i32 : i32, i32, i32
  }
}

</mosaic_0001>

<bundles_post_ra>
// kernel: tile.13
= control target key start
LH: loop header
LB: loop body
LE: loop exit
PB: predicated region body
PF: predicated region fallthrough
CT: control target
= control target key end

     0   :  { %s22_s0 = inlined_call_operand.vmem [shape: f32[8], index: 0, kind: input, shape index: {}]   ;;  %s23_s1 = inlined_call_operand.vmem [shape: f32[2,8], index: 1, kind: output, shape index: {}]  }
   0x1   :  { %v4_v0 = vld [vmem:[%s22_s0] ss:$0 sm:$0xff] }
   0x2   :  { %5 = vst [vmem:[%s23_s1] sm:$0x3] %v4_v0 }

// kernel: tile.14
= control target key start
LH: loop header
LB: loop body
LE: loop exit
PB: predicated region body
PF: predicated region fallthrough
CT: control target
= control target key end

     0   :  { %vm7_vm0 = vcmask 64512   ;;  %vm13_vm1 = vcmask 130112   ;;  %s39_s0 = inlined_call_operand.vmem [shape: f32[2,8], index: 0, kind: input, shape index: {}]   ;;  %s40_s1 = inlined_call_operand.vmem [shape: f32[1,16], index: 1, kind: output, shape index: {}]  }
   0x1   :  { %v4_v0 = vld [vmem:[%s39_s0] sm:$0x3]  ;;  %s22_s0 = smov 8  }
   0x2   :  { %5 = vst [vmem:[#allocation1] sm:$0x3] %v4_v0 }
   0x9   :  { %v10_v1 = vld [vmem:[#allocation1 + $0x1] sm:$0x1]   ;;  %v6_v2 = vld [vmem:[#allocation1] sm:$0x1]  }
   0xa   :  { %11 = vrot.lane.b32.xlu0 %v10_v1, %s22_s0  ;;  %8 = vst.msk [vmem:[#allocation0] sm:$0x1] %vm7_vm0, %v6_v2  }
  0x7c   :  { %v12_v3 = vpop.permute.xlu0 %11  }
  0x7d   :  { %14 = vst.msk [vmem:[#allocation0] sm:$0x1] %vm13_vm1, %v12_v3  }
  0x84   :  { %v17_v4 = vld [vmem:[#allocation0] sm:$0x1] }
  0x85   :  { %20 = vst [vmem:[%s40_s1] sm:$0x1] %v17_v4 }

// kernel: transition_block_forward.1
= control target key start
LH: loop header
LB: loop body
LE: loop exit
PB: predicated region body
PF: predicated region fallthrough
CT: control target
= control target key end

     0   :  { %s583_s15 = smov 0   ;;  %s585_s16 = smov 0   ;;  %s661_s0 = inlined_call_operand.vmem [shape: f32[2,128,16], index: 0, kind: input, shape index: {}]   ;;  %s662_s1 = inlined_call_operand.vmem [shape: f32[1,16], index: 1, kind: input, shape index: {}]   ;;  %s663_s2 = inlined_call_operand.vmem [shape: f32[1,16], index: 2, kind: input, shape index: {}]   ;;  %s664_s3 = inlined_call_operand.vmem [shape: bf16[8,4], index: 3, kind: input, shape index: {}]   ;;  %s665_s4 = inlined_call_operand.vmem [shape: f32[2,64,4], index: 4, kind: output, shape index: {}]  }
   0x1   :  { %s587_s17 = smov 0   ;;  %s589_s18 = smov 0  }
   0x2   :  { %s591_s19 = smov 0  }
   0x3 LB: > { %s23_s20 = sadd.s32 1, %s547_s17  ;;  %s26_s21 = sadd.s32 1, %s551_s18  ;;  %s555_s19 = sphi %s591_s19, %s14_s19   ;;  %s551_s18 = sphi %s589_s18, %s669_s18   ;;  %s547_s17 = sphi %s587_s17, %s668_s17   ;;  %s543_s16 = sphi %s585_s16, %s667_s16   ;;  %s539_s15 = sphi %s583_s15, %s666_s15  }
   0x4   : > { %p24_p0 = scmp.ge.s32.totalorder %s23_s20, 2  ;;  %p462_p1 = scmp.ge.s32.totalorder %s555_s19, 1 }
   0x5   : > { %p183_p2 = scmp.lt.s32.totalorder %s555_s19, 5 }
   0x6   : > { %s671_s20 = smov (%p24_p0, %s23_s20), 0  ;;  %s673_s21 = smov (!%p24_p0, %s26_s21), %s551_s18 }
   0x7   : > { %p184_p3 = pnand %p462_p1, %p183_p2  ;;  %p28_p4 = scmp.ge.s32.totalorder %s673_s21, 2 }
   0x8   : > { %s463_s22 = sshll.u32 (!%p184_p3), %s539_s15, 3  ;;  %p218_p5 = scmp.lt.s32.totalorder (!%p184_p3), %s543_s16, 1 }
   0x9   : > { %s675_s21 = smov (%p28_p4, %s673_s21), 0  ;;  %187 = sbr.rel (%p184_p3) target bundleno = 299 (0x12b), region = 36 }
   0xa   : > { %p220_p6 = scmp.lt.s32.totalorder (!%p184_p3), %s463_s22, 15  ;;  %s557_s7 = smov (!%p184_p3), 120  }
   0xb   : > { %s466_s10 = sshll.u32 (!%p184_p3), %s539_s15, 2 }
   0xc   : > { %p230_p7 = scmp.lt.s32.totalorder (!%p184_p3), %s466_s10, 7 }
   0xe   : > { %s677_s16 = smov (!%p218_p5, %s543_s16), 1  ;;  %s679_s22 = smov (!%p220_p6, %s463_s22), 15  ;;  %v515_v0 = vld [vmem:[%s662_s1] ss:$0 sm:$0xff]  ;;  %vm340_vm0 = vcmask 1043456   ;;  %vm318_vm1 = vcmask 64512  }
   0xf   : > { %s464_s23 = sshll.u32 %s677_s16, 4  ;;  %v516_v1 = vld [vmem:[%s663_s2] ss:$0 sm:$0xff]  ;;  %s681_s10 = smov (!%p230_p7, %s466_s10), 7  ;;  %vm363_vm2 = vcmask 31744  }
  0x10   : > { %s223_s24 = sadd.s32 %s464_s23, %s679_s22  ;;  %v333_v34 = vld [vmem:[%s664_s3] sm:$0xf]  ;;  %s467_s11 = sshll.u32 %s677_s16, 3 }
  0x11   : > { %s465_s27 = sshll.u32 %s223_s24, 3  ;;  %v342_v35 = vsel %vm340_vm0, %v333_v34, 0  ;;  %s233_s12 = sadd.s32 %s467_s11, %s681_s10 }
  0x12   : > { %s225_s30 = scalar_lea.vmem %s661_s0, %s465_s27  ;;  %351 = vmatpush.bf16.msra.mxu0 %v342_v35  ;;  %473 = vmatpush.bf16.msra.mxu1 %v342_v35  ;;  %s468_s13 = sshll.u32 %s233_s12, 3 }
  0x13   : > { %v240_v2 = vld [vmem:[%s225_s30 + $0x10] sm:$0xff]  ;;  %v238_v3 = vld [vmem:[%s225_s30] sm:$0xff]  ;;  %v241_v4 = vld [vmem:[%s225_s30 + $0x18] sm:$0xff]  ;;  %s235_s23 = scalar_lea.vmem %s665_s4, %s468_s13 }
  0x14   : > { %v252_v5 = vmul.f32 %v515_v0, %v240_v2  ;;  %v250_v6 = vmul.f32 %v515_v0, %v238_v3  ;;  %v239_v7 = vld [vmem:[%s225_s30 + $0x8] sm:$0xff]  ;;  %v253_v8 = vmul.f32 %v515_v0, %v241_v4  ;;  %v242_v9 = vld [vmem:[%s225_s30 + $0x20] sm:$0xff]  ;;  %v245_v22 = vld [vmem:[%s225_s30 + $0x38] sm:$0xff] }
  0x15   : > { %v243_v10 = vld [vmem:[%s225_s30 + $0x28] sm:$0xff]  ;;  %v251_v13 = vmul.f32 %v515_v0, %v239_v7  ;;  %v254_v14 = vmul.f32 %v515_v0, %v242_v9  ;;  %v244_v23 = vld [vmem:[%s225_s30 + $0x30] sm:$0xff]  ;;  %v257_v27 = vmul.f32 %v515_v0, %v245_v22 }
  0x16   : > { %v264_v11 = vadd.f32 %v516_v1, %v252_v5  ;;  %v262_v12 = vadd.f32 %v516_v1, %v250_v6  ;;  %v255_v18 = vmul.f32 %v515_v0, %v243_v10  ;;  %v265_v19 = vadd.f32 %v516_v1, %v253_v8 }
  0x17   : > { %v266_v17 = vadd.f32 %v516_v1, %v254_v14  ;;  %v263_v20 = vadd.f32 %v516_v1, %v251_v13  ;;  %v256_v28 = vmul.f32 %v515_v0, %v244_v23  ;;  %v269_v30 = vadd.f32 %v516_v1, %v257_v27 }
  0x18   : > { %v272_v15 = vmax.f32 %v264_v11, 0.0  ;;  %v270_v16 = vmax.f32 %v262_v12, 0.0  ;;  %v267_v24 = vadd.f32 %v516_v1, %v255_v18  ;;  %v273_v25 = vmax.f32 %v265_v19, 0.0 }
  0x19   : > { %v274_v21 = vmax.f32 %v266_v17, 0.0  ;;  %v271_v26 = vmax.f32 %v263_v20, 0.0  ;;  %v268_v31 = vadd.f32 %v516_v1, %v256_v28  ;;  %v277_v32 = vmax.f32 %v269_v30, 0.0 }
  0x1a   : > { %290 = vrot.lane.b32.xlu1 %v272_v15, %s557_s7  ;;  %286 = vrot.lane.b32.xlu0 %v270_v16, %s557_s7  ;;  %v275_v29 = vmax.f32 %v267_v24, 0.0 }
  0x1b   : > { %294 = vrot.lane.b32.xlu2 %v274_v21, %s557_s7  ;;  %v276_v33 = vmax.f32 %v268_v31, 0.0 }
  0x22   : > { %292 = vrot.lane.b32.xlu1 %v273_v25, %s557_s7  ;;  %288 = vrot.lane.b32.xlu0 %v271_v26, %s557_s7 }
  0x23   : > { %296 = vrot.lane.b32.xlu2 %v275_v29, %s557_s7 }
  0x2a   : > { %300 = vrot.lane.b32.xlu1 %v277_v32, %s557_s7  ;;  %298 = vrot.lane.b32.xlu0 %v276_v33, %s557_s7 }
  0x75   : > { %v295_v36 = vpop.permute.xlu2 %294 }
  0x76   : > { %v314_v52 = vadd.f32 %v295_v36, %v274_v21 }
  0x78   : > { %v325_v57 = vsel %vm318_vm1, %v314_v52, 0.0 }
  0x7d   : > { %v297_v45 = vpop.permute.xlu2 %296 }
  0x7e   : > { %v315_v53 = vadd.f32 %v297_v45, %v275_v29 }
  0x80   : > { %v326_v58 = vsel %vm318_vm1, %v315_v53, 0.0 }
  0x81   : > { %v327_v63 = vadd.f32 %v326_v58, %v325_v57 }
  0x8c   : > { %v291_v37 = vpop.permute.xlu1 %290  ;;  %v287_v38 = vpop.permute.xlu0 %286 }
  0x8d   : > { %v312_v39 = vadd.f32 %v291_v37, %v272_v15  ;;  %v310_v40 = vadd.f32 %v287_v38, %v270_v16 }
  0x8f   : > { %v322_v46 = vsel %vm318_vm1, %v312_v39, 0.0  ;;  %v319_v47 = vsel %vm318_vm1, %v310_v40, 0.0 }
  0x94   : > { %v293_v41 = vpop.permute.xlu1 %292  ;;  %v289_v42 = vpop.permute.xlu0 %288 }
  0x95   : > { %v313_v43 = vadd.f32 %v293_v41, %v273_v25  ;;  %v311_v44 = vadd.f32 %v289_v42, %v271_v26 }
  0x97   : > { %v323_v48 = vsel %vm318_vm1, %v313_v43, 0.0  ;;  %v320_v49 = vsel %vm318_vm1, %v311_v44, 0.0 }
  0x98   : > { %v324_v50 = vadd.f32 %v323_v48, %v322_v46  ;;  %v321_v51 = vadd.f32 %v320_v49, %v319_v47 }
  0x9a   : > { %v331_v54 = vpack.c.bf16 %v324_v50, %v321_v51 }
  0x9c   : > { %v301_v55 = vpop.permute.xlu1 %300  ;;  %469 = vmatmul.msk.bf16.vlgmr.msra.gmra.mxu0 %vm318_vm1, %v331_v54  ;;  %v299_v56 = vpop.permute.xlu0 %298 }
  0x9d   : > { %v317_v59 = vadd.f32 %v301_v55, %v277_v32  ;;  %v316_v60 = vadd.f32 %v299_v56, %v276_v33 }
  0x9f   : > { %v329_v61 = vsel %vm318_vm1, %v317_v59, 0.0  ;;  %v328_v62 = vsel %vm318_vm1, %v316_v60, 0.0 }
  0xa0   : > { %v330_v0 = vadd.f32 %v329_v61, %v328_v62 }
  0xa2   : > { %v332_v1 = vpack.c.bf16 %v330_v0, %v327_v63 }
  0xa4   : > { %470 = vmatmul.msk.bf16.vlgmr.msra.gmra.mxu1 %vm318_vm1, %v332_v1 }
 0x119   : > { %v353_v2 = vpop.f32.mrf.mxu0 }
 0x11a   : > { %364 = vst.msk [vmem:[%s235_s23] sm:$0xff] %vm363_vm2, %v353_v2 }
 0x121   : > { %v355_v3 = vpop.f32.mrf.mxu0  ;;  %v358_v4 = vpop.f32.mrf.mxu1 }
 0x122   : > { %365 = vst.msk [vmem:[%s235_s23 + $0x8] sm:$0xff] %vm363_vm2, %v355_v3 }
 0x123   : > { %366 = vst.msk [vmem:[%s235_s23 + $0x10] sm:$0xff] %vm363_vm2, %v358_v4 }
 0x129   : > { %v360_v5 = vpop.f32.mrf.mxu1 }
 0x12a   : > { %367 = vst.msk [vmem:[%s235_s23 + $0x18] sm:$0xff] %vm363_vm2, %v360_v5 }
 0x12b PF: > { %s14_s19 = sadd.s32 1, %s555_s19   ;;  %s666_s15 = smov %s547_s17 }
 0x12c   : > { %p11_p8 = scmp.ge.s32.totalorder %s14_s19, 6   ;;  %s667_s16 = smov %s551_s18 }
 0x12d   : > { %s668_s17 = smov %s671_s20  ;;  %s669_s18 = smov %s675_s21 }
 0x12e   :  { %13 = sbr.rel (!%p11_p8) target bundleno = 3 (0x3), region = 66 }

</bundles_post_ra>
